<compile_context>
chip_gen: v5e
topology: v5e:2x2
jax: 0.10.0
libtpu: 0.0.40
codegen_flags: <defaults>
</compile_context>

<pallas_src>
import functools

import jax
import jax.numpy as jnp
from jax.experimental import pallas as pl
from jax.experimental.pallas import tpu as pltpu


def _round_up(x, m):
    return (x + m - 1) // m * m


def _round_down(x, m):
    return (x // m) * m


def _vmem_limit_bytes():
    """Generation-aware scoped-VMEM limit (v5e/v6e: 128 MiB phys, v7x: 64 MiB)."""
    try:
        cap = int(pltpu.get_tpu_info().vmem_capacity_bytes)
    except Exception:
        cap = 64 * 1024 * 1024          # conservative: assume smallest (v7x per-TC)
    return min(96 * 1024 * 1024, (cap * 3) // 4)


def _focal_loss_kernel(logits_ref, tgt_ref, out_ref, m_ref, l_ref, t_ref, *,
                       alpha, gamma, num_classes, n_valid, tc, tn):
    """One (sample-block i, class-chunk j) grid step.

    logits_ref: (tc, tn) float  -- classes on sublanes, samples on lanes
    tgt_ref   : (1, tn) int32      out_ref: (1, tn) f32
    m/l/t_ref : (1, tn) f32 VMEM scratch; online-softmax accumulators that
                persist across the trailing 'arbitrary' class-chunk axis.
    """
    i = pl.program_id(0)              # sample-block index (parallel)
    j = pl.program_id(1)              # class-chunk index (reduction)
    ncb = pl.num_programs(1)

    @pl.when(j == 0)
    def _init():
        m_ref[...] = jnp.full_like(m_ref, -1e30)
        l_ref[...] = jnp.zeros_like(l_ref)
        t_ref[...] = jnp.zeros_like(t_ref)

    x = logits_ref[...].astype(jnp.float32)                    # (tc, tn)
    tgt = tgt_ref[...]                                         # (1, tn)

    # Global class id per sublane row of this chunk; mask class padding (last
    # chunk when num_classes % tc != 0) so it contributes nothing.
    cls = jax.lax.broadcasted_iota(jnp.int32, x.shape, 0) + j * tc
    x = jnp.where(cls < num_classes, x, jnp.float32(-1e30))

    # Online log-sum-exp over the class (sublane) axis.
    chunk_max = jnp.max(x, axis=0, keepdims=True)              # (1, tn)
    m_prev = m_ref[...]
    m_new = jnp.maximum(m_prev, chunk_max)
    p = jnp.exp(x - m_new)                                     # lane-dense EUP tile
    l_ref[...] = l_ref[...] * jnp.exp(m_prev - m_new) + jnp.sum(p, axis=0,
                                                                keepdims=True)
    m_ref[...] = m_new

    # Target-class logit: iota/compare/select gather (the target class falls in
    # exactly one chunk, so the masked sum accumulates it exactly once).
    t_ref[...] += jnp.sum(jnp.where(cls == tgt, x, 0.0), axis=0, keepdims=True)

    @pl.when(j == ncb - 1)
    def _finalize():
        m = m_ref[...]
        l = l_ref[...]
        t = t_ref[...]
        ce = (m - t) + jnp.log(l)                              # cross-entropy
        # pt from the running sum-of-exp (one exp + reciprocal path) instead of
        # a second exp(-ce).
        pt = jnp.exp(t - m) / l
        omp = jnp.maximum(1.0 - pt, 0.0)    # pt can exceed 1 by a ULP -> pow NaN

        g = float(gamma)
        if g == int(g) and int(g) >= 0:
            # integer-power specialization: cheap VPU multiplies
            mod = jnp.ones_like(omp)
            for _ in range(int(g)):
                mod = mod * omp
        else:
            mod = omp ** g

        loss = alpha * mod * ce
        # Ragged tail: zero lanes past the true sample count (partial blocks
        # bring in undefined data there -- it stays confined to those lanes).
        sample = i * tn + jax.lax.broadcasted_iota(jnp.int32, loss.shape, 1)
        out_ref[...] = jnp.where(sample < n_valid, loss, 0.0)


def focal_loss(logits, targets, alpha=0.25, gamma=2.0, reduction='none'):
    """Matches FocalLoss.forward: alpha * (1 - pt)**gamma * CE(logits, targets)."""
    N, C = logits.shape
    itemsize = jnp.dtype(logits.dtype).itemsize

    vmem_limit = _vmem_limit_bytes()
    # One logits block must leave room for its double-buffer plus the f32
    # exp / iota / select intermediates (~4 block-sized live tensors) -> budget
    # a single block at ~1/6 of the scoped-VMEM limit.
    block_budget = vmem_limit // 6

    n_lanes = _round_up(N, 128)              # samples live on the lane axis
    lane_cap = 128 * 1024                    # ~4 MiB f32 block at C=8

    tn_budget = _round_down(block_budget // (C * itemsize), 128)
    if tn_budget >= 128:
        # Common case: the whole class axis fits in one block (single chunk).
        tc = C
        tn = max(128, min(tn_budget, lane_cap, n_lanes))
    else:
        # Large-C path: chunk the class axis; online softmax accumulates in
        # VMEM scratch across the trailing 'arbitrary' grid dimension.
        tn = max(128, min(512, n_lanes))
        tc = max(8, _round_down(block_budget // (tn * itemsize), 8))
        tc = min(tc, _round_up(C, 8))
    # Keep >= 2 sample blocks when possible so the 'parallel' axis can be
    # sharded across both TensorCores of a v7x chip.
    if tn == n_lanes and tn >= 256:
        tn = _round_up(n_lanes // 2, 128)

    nb = pl.cdiv(n_lanes, tn)
    cb = pl.cdiv(C, tc)

    # Single host relayout to (C, N) -- classes on sublanes, samples on lanes.
    # (See header comment: natural-layout (tn, C) blocks were rejected because
    # a C-wide minor dim inflates VMEM tiles 128/C-fold and strangles the DMA.)
    logits_t = logits.T
    tgt2d = targets.astype(jnp.int32).reshape(1, N)
    if n_lanes != N:   # only unaligned N pays a pad copy; aligned N is free
        logits_t = jnp.pad(logits_t, ((0, 0), (0, n_lanes - N)))
        tgt2d = jnp.pad(tgt2d, ((0, 0), (0, n_lanes - N)))

    kernel = functools.partial(_focal_loss_kernel, alpha=float(alpha),
                               gamma=float(gamma), num_classes=C, n_valid=N,
                               tc=tc, tn=tn)

    cost = pl.CostEstimate(
        flops=int(10 * n_lanes * C),
        transcendentals=int(n_lanes * C + 4 * n_lanes),
        bytes_accessed=int(n_lanes * C * itemsize + 2 * n_lanes * 4),
    )

    out = pl.pallas_call(
        kernel,
        out_shape=jax.ShapeDtypeStruct((1, nb * tn), jnp.float32),
        grid_spec=pltpu.PrefetchScalarGridSpec(
            num_scalar_prefetch=0,
            grid=(nb, cb),
            in_specs=[
                pl.BlockSpec((tc, tn), lambda i, j: (j, i)),   # logits (C chunk, samples)
                pl.BlockSpec((1, tn), lambda i, j: (0, i)),    # targets, lane-dense
            ],
            out_specs=pl.BlockSpec((1, tn), lambda i, j: (0, i)),
            scratch_shapes=[
                pltpu.VMEM((1, tn), jnp.float32),   # running max
                pltpu.VMEM((1, tn), jnp.float32),   # running sum of exp
                pltpu.VMEM((1, tn), jnp.float32),   # target logit
            ],
        ),
        compiler_params=pltpu.CompilerParams(
            dimension_semantics=("parallel", "arbitrary"),
            vmem_limit_bytes=int(vmem_limit)),
        cost_estimate=cost,
    )(logits_t, tgt2d)

    per_sample = out[0, :N]
    # TODO(synk): for reduction='mean'/'sum' an in-kernel scalar accumulator
    # would skip the per-sample HBM write; kept wrapper-side ('none' is default).
    if reduction == 'mean':
        return per_sample.mean()
    elif reduction == 'sum':
        return per_sample.sum()
    return per_sample


if __name__ == "__main__":
    key = jax.random.PRNGKey(0)
    k1, k2 = jax.random.split(key)

    N, C = 200, 8                               # small; exercises ragged-N mask + 2 sample blocks
    logits = jax.random.normal(k1, (N, C), dtype=jnp.float32)
    targets = jax.random.randint(k2, (N,), 0, C, dtype=jnp.int32)

    loss = focal_loss(logits, targets, alpha=0.25, gamma=2.0, reduction='none')
    jax.block_until_ready(loss)

    # Plain-JAX reference (same math as the PyTorch module).
    logp = jax.nn.log_softmax(logits, axis=-1)
    ce_ref = -jnp.take_along_axis(logp, targets[:, None], axis=-1)[:, 0]
    pt_ref = jnp.exp(-ce_ref)
    ref = 0.25 * (1.0 - pt_ref) ** 2.0 * ce_ref

    assert loss.shape == (N,)
    assert jnp.allclose(loss, ref, atol=1e-5, rtol=1e-4), "per-sample mismatch vs reference"

    loss_mean = focal_loss(logits, targets, alpha=0.25, gamma=2.0, reduction='mean')
    jax.block_until_ready(loss_mean)
    assert jnp.allclose(loss_mean, ref.mean(), atol=1e-5, rtol=1e-4), "mean mismatch"

    print("KERNEL_OK")
</pallas_src>

<mosaic_0001>
module attributes {stable_mosaic.version = 11 : i64} {
  func.func @_focal_loss_kernel(%arg0: i32, %arg1: i32, %arg2: memref<8x128xf32, #tpu.memory_space<vmem>>, %arg3: memref<1x128xi32, #tpu.memory_space<vmem>>, %arg4: memref<1x128xf32, #tpu.memory_space<vmem>>, %arg5: memref<1x128xf32, #tpu.memory_space<vmem>>, %arg6: memref<1x128xf32, #tpu.memory_space<vmem>>, %arg7: memref<1x128xf32, #tpu.memory_space<vmem>>) attributes {dimension_semantics = [#tpu.dimension_semantics<parallel>, #tpu.dimension_semantics<arbitrary>], iteration_bounds = array<i64: 2, 1>, scalar_prefetch = 0 : i64, scratch_operands = 3 : i64, tpu.core_type = #tpu.core_type<tc>, window_params = [{transform_indices = @transform_0, window_bounds = array<i64: 8, 128>}, {transform_indices = @transform_1, window_bounds = array<i64: 1, 128>}, {transform_indices = @transform_2, window_bounds = array<i64: 1, 128>}]} {
    %c0_i32 = arith.constant 0 : i32
    %0 = arith.cmpi eq, %arg1, %c0_i32 : i32
    %1 = arith.extui %0 : i1 to i32
    %c0_i32_0 = arith.constant 0 : i32
    %2 = arith.cmpi ne, %1, %c0_i32_0 : i32
    scf.if %2 {
      %cst_23 = arith.constant -1.000000e+30 : f32
      %41 = vector.broadcast %cst_23 : f32 to vector<1x128xf32>
      %c0_24 = arith.constant 0 : index
      %c0_25 = arith.constant 0 : index
      %42 = vector.load %arg5[%c0_24, %c0_25] : memref<1x128xf32, #tpu.memory_space<vmem>>, vector<1x128xf32>
      tpu.vector_store %arg5[%c0_24, %c0_25], %41 {strides = array<i32>} : memref<1x128xf32, #tpu.memory_space<vmem>>, vector<1x128xf32>,
      %cst_26 = arith.constant 0.000000e+00 : f32
      %43 = vector.broadcast %cst_26 : f32 to vector<1x128xf32>
      %c0_27 = arith.constant 0 : index
      %c0_28 = arith.constant 0 : index
      %44 = vector.load %arg6[%c0_27, %c0_28] : memref<1x128xf32, #tpu.memory_space<vmem>>, vector<1x128xf32>
      tpu.vector_store %arg6[%c0_27, %c0_28], %43 {strides = array<i32>} : memref<1x128xf32, #tpu.memory_space<vmem>>, vector<1x128xf32>,
      %cst_29 = arith.constant 0.000000e+00 : f32
      %45 = vector.broadcast %cst_29 : f32 to vector<1x128xf32>
      %c0_30 = arith.constant 0 : index
      %c0_31 = arith.constant 0 : index
      %46 = vector.load %arg7[%c0_30, %c0_31] : memref<1x128xf32, #tpu.memory_space<vmem>>, vector<1x128xf32>
      tpu.vector_store %arg7[%c0_30, %c0_31], %45 {strides = array<i32>} : memref<1x128xf32, #tpu.memory_space<vmem>>, vector<1x128xf32>,
    } else {
    }
    %c0 = arith.constant 0 : index
    %c0_1 = arith.constant 0 : index
    %3 = vector.load %arg2[%c0, %c0_1] : memref<8x128xf32, #tpu.memory_space<vmem>>, vector<8x128xf32>
    %c0_2 = arith.constant 0 : index
    %c0_3 = arith.constant 0 : index
    %4 = vector.load %arg3[%c0_2, %c0_3] : memref<1x128xi32, #tpu.memory_space<vmem>>, vector<1x128xi32>
    %5 = tpu.iota {dimensions = array<i32: 0>} : vector<8x128xi32>
    %c8_i32 = arith.constant 8 : i32
    %6 = arith.muli %arg1, %c8_i32 : i32
    %7 = vector.broadcast %6 : i32 to vector<8x128xi32>
    %8 = arith.addi %5, %7 : vector<8x128xi32>
    %c8_i32_4 = arith.constant 8 : i32
    %9 = vector.broadcast %c8_i32_4 : i32 to vector<8x128xi32>
    %10 = arith.cmpi slt, %8, %9 : vector<8x128xi32>
    %cst = arith.constant -1.000000e+30 : f32
    %11 = vector.broadcast %cst : f32 to vector<8x128xf32>
    %12 = arith.select %10, %3, %11 : vector<8x128xi1>, vector<8x128xf32>
    %cst_5 = arith.constant dense<0xFF800000> : vector<128xf32>
    %13 = vector.multi_reduction <maximumf>, %12, %cst_5 [0] : vector<8x128xf32> to vector<128xf32>
    %14 = vector.shape_cast %13 : vector<128xf32> to vector<1x128xf32>
    %c0_6 = arith.constant 0 : index
    %c0_7 = arith.constant 0 : index
    %15 = vector.load %arg5[%c0_6, %c0_7] : memref<1x128xf32, #tpu.memory_space<vmem>>, vector<1x128xf32>
    %16 = arith.maximumf %15, %14 : vector<1x128xf32>
    %17 = vector.broadcast %16 : vector<1x128xf32> to vector<8x128xf32>
    %18 = arith.subf %12, %17 : vector<8x128xf32>
    %19 = math.exp %18 : vector<8x128xf32>
    %c0_8 = arith.constant 0 : index
    %c0_9 = arith.constant 0 : index
    %20 = vector.load %arg6[%c0_8, %c0_9] : memref<1x128xf32, #tpu.memory_space<vmem>>, vector<1x128xf32>
    %21 = arith.subf %15, %16 : vector<1x128xf32>
    %22 = math.exp %21 : vector<1x128xf32>
    %23 = arith.mulf %20, %22 : vector<1x128xf32>
    %cst_10 = arith.constant dense<0.000000e+00> : vector<128xf32>
    %24 = vector.multi_reduction <add>, %19, %cst_10 [0] : vector<8x128xf32> to vector<128xf32>
    %25 = vector.shape_cast %24 : vector<128xf32> to vector<1x128xf32>
    %26 = arith.addf %23, %25 : vector<1x128xf32>
    %c0_11 = arith.constant 0 : index
    %c0_12 = arith.constant 0 : index
    %27 = vector.load %arg6[%c0_11, %c0_12] : memref<1x128xf32, #tpu.memory_space<vmem>>, vector<1x128xf32>
    tpu.vector_store %arg6[%c0_11, %c0_12], %26 {strides = array<i32>} : memref<1x128xf32, #tpu.memory_space<vmem>>, vector<1x128xf32>,
    %c0_13 = arith.constant 0 : index
    %c0_14 = arith.constant 0 : index
    %28 = vector.load %arg5[%c0_13, %c0_14] : memref<1x128xf32, #tpu.memory_space<vmem>>, vector<1x128xf32>
    tpu.vector_store %arg5[%c0_13, %c0_14], %16 {strides = array<i32>} : memref<1x128xf32, #tpu.memory_space<vmem>>, vector<1x128xf32>,
    %c0_15 = arith.constant 0 : index
    %c0_16 = arith.constant 0 : index
    %29 = vector.load %arg7[%c0_15, %c0_16] : memref<1x128xf32, #tpu.memory_space<vmem>>, vector<1x128xf32>
    %30 = vector.broadcast %4 : vector<1x128xi32> to vector<8x128xi32>
    %31 = arith.cmpi eq, %8, %30 : vector<8x128xi32>
    %cst_17 = arith.constant 0.000000e+00 : f32
    %32 = vector.broadcast %cst_17 : f32 to vector<8x128xf32>
    %33 = arith.select %31, %12, %32 : vector<8x128xi1>, vector<8x128xf32>
    %cst_18 = arith.constant dense<0.000000e+00> : vector<128xf32>
    %34 = vector.multi_reduction <add>, %33, %cst_18 [0] : vector<8x128xf32> to vector<128xf32>
    %35 = vector.shape_cast %34 : vector<128xf32> to vector<1x128xf32>
    %36 = arith.addf %29, %35 : vector<1x128xf32>
    %c0_19 = arith.constant 0 : index
    %c0_20 = arith.constant 0 : index
    %37 = vector.load %arg7[%c0_19, %c0_20] : memref<1x128xf32, #tpu.memory_space<vmem>>, vector<1x128xf32>
    tpu.vector_store %arg7[%c0_19, %c0_20], %36 {strides = array<i32>} : memref<1x128xf32, #tpu.memory_space<vmem>>, vector<1x128xf32>,
    %c0_i32_21 = arith.constant 0 : i32
    %38 = arith.cmpi eq, %arg1, %c0_i32_21 : i32
    %39 = arith.extui %38 : i1 to i32
    %c0_i32_22 = arith.constant 0 : i32
    %40 = arith.cmpi ne, %39, %c0_i32_22 : i32
    scf.if %40 {
      %c0_23 = arith.constant 0 : index
      %c0_24 = arith.constant 0 : index
      %41 = vector.load %arg5[%c0_23, %c0_24] : memref<1x128xf32, #tpu.memory_space<vmem>>, vector<1x128xf32>
      %c0_25 = arith.constant 0 : index
      %c0_26 = arith.constant 0 : index
      %42 = vector.load %arg6[%c0_25, %c0_26] : memref<1x128xf32, #tpu.memory_space<vmem>>, vector<1x128xf32>
      %c0_27 = arith.constant 0 : index
      %c0_28 = arith.constant 0 : index
      %43 = vector.load %arg7[%c0_27, %c0_28] : memref<1x128xf32, #tpu.memory_space<vmem>>, vector<1x128xf32>
      %44 = arith.subf %41, %43 : vector<1x128xf32>
      %45 = math.log %42 : vector<1x128xf32>
      %46 = arith.addf %44, %45 : vector<1x128xf32>
      %47 = arith.subf %43, %41 : vector<1x128xf32>
      %48 = math.exp %47 : vector<1x128xf32>
      %49 = arith.divf %48, %42 : vector<1x128xf32>
      %cst_29 = arith.constant 1.000000e+00 : f32
      %50 = vector.broadcast %cst_29 : f32 to vector<1x128xf32>
      %51 = arith.subf %50, %49 : vector<1x128xf32>
      %cst_30 = arith.constant 0.000000e+00 : f32
      %52 = vector.broadcast %cst_30 : f32 to vector<1x128xf32>
      %53 = arith.maximumf %51, %52 : vector<1x128xf32>
      %cst_31 = arith.constant 1.000000e+00 : f32
      %54 = vector.broadcast %cst_31 : f32 to vector<1x128xf32>
      %55 = arith.mulf %54, %53 : vector<1x128xf32>
      %56 = arith.mulf %55, %53 : vector<1x128xf32>
      %cst_32 = arith.constant 2.500000e-01 : f32
      %57 = vector.broadcast %cst_32 : f32 to vector<1x128xf32>
      %58 = arith.mulf %57, %56 : vector<1x128xf32>
      %59 = arith.mulf %58, %46 : vector<1x128xf32>
      %c128_i32 = arith.constant 128 : i32
      %60 = arith.muli %arg0, %c128_i32 : i32
      %61 = tpu.iota {dimensions = array<i32: 1>} : vector<1x128xi32>
      %62 = vector.broadcast %60 : i32 to vector<1x128xi32>
      %63 = arith.addi %62, %61 : vector<1x128xi32>
      %c200_i32 = arith.constant 200 : i32
      %64 = vector.broadcast %c200_i32 : i32 to vector<1x128xi32>
      %65 = arith.cmpi slt, %63, %64 : vector<1x128xi32>
      %cst_33 = arith.constant 0.000000e+00 : f32
      %66 = vector.broadcast %cst_33 : f32 to vector<1x128xf32>
      %67 = arith.select %65, %59, %66 : vector<1x128xi1>, vector<1x128xf32>
      %c0_34 = arith.constant 0 : index
      %c0_35 = arith.constant 0 : index
      %68 = vector.load %arg4[%c0_34, %c0_35] : memref<1x128xf32, #tpu.memory_space<vmem>>, vector<1x128xf32>
      tpu.vector_store %arg4[%c0_34, %c0_35], %67 {strides = array<i32>} : memref<1x128xf32, #tpu.memory_space<vmem>>, vector<1x128xf32>,
    } else {
    }
    return
  }
  func.func @transform_0(%arg0: i32, %arg1: i32) -> (i32, i32) {
    %c0_i32 = arith.constant 0 : i32
    return %arg1, %arg0 : i32, i32
  }
  func.func @transform_1(%arg0: i32, %arg1: i32) -> (i32, i32) {
    %c0_i32 = arith.constant 0 : i32
    %c0_i32_0 = arith.constant 0 : i32
    return %c0_i32, %arg0 : i32, i32
  }
  func.func @transform_2(%arg0: i32, %arg1: i32) -> (i32, i32) {
    %c0_i32 = arith.constant 0 : i32
    %c0_i32_0 = arith.constant 0 : i32
    return %c0_i32, %arg0 : i32, i32
  }
}

</mosaic_0001>

<bundles_post_ra>
// kernel: tpu_custom_call.1
= control target key start
LH: loop header
LB: loop body
LE: loop exit
PB: predicated region body
PF: predicated region fallthrough
CT: control target
= control target key end

     0   :  { %7 = vsyncpa [#allocation6], 0  ;;  %s806_s0 = inlined_call_operand.hbm [shape: f32[8,256], index: 0, kind: input, shape index: {}]   ;;  %s807_s1 = inlined_call_operand.hbm [shape: s32[1,256], index: 1, kind: input, shape index: {}]   ;;  %s808_s2 = inlined_call_operand.hbm [shape: f32[1,256], index: 2, kind: output, shape index: {}]  }
   0x1   :  { %9 = vsyncpa [#allocation6 + $0x1], 0 }
   0x2   :  { %10 = vsyncpa [#allocation9], 0 }
   0x3   :  { %12 = vsyncpa [#allocation9 + $0x1], 0 }
   0x4   :  { %13 = vsyncpa [#allocation7], 0 }
   0x5   :  { %15 = vsyncpa [#allocation7 + $0x1], 0  ;;  %s672_s9 = smov 0   ;;  %s674_s10 = smov 0  }
   0x6   :  { %s676_s11 = smov 0   ;;  %s678_s12 = smov 0  }
   0x7   :  { %s680_s13 = smov 0   ;;  %s682_s14 = smov 0  }
   0x8 LB: > { %s416_s15 = sadd.s32 4294967295, %s653_s14   ;;  %s417_s16 = sadd.s32 4294967294, %s653_s14   ;;  %s653_s14 = sphi %s682_s14, %s21_s14   ;;  %s649_s13 = sphi %s680_s13, %s817_s13   ;;  %s645_s12 = sphi %s678_s12, %s816_s12   ;;  %s641_s11 = sphi %s676_s11, %s815_s11   ;;  %s637_s10 = sphi %s674_s10, %s814_s10   ;;  %s633_s9 = sphi %s672_s9, %s813_s9  }
   0x9   : > { %s33_s17 = sadd.s32 1, %s649_s13  ;;  %s42_s18 = sadd.s32 1, %s641_s11 }
   0xa   : > { %p35_p0 = scmp.ge.s32.totalorder %s33_s17, 2  ;;  %p49_p1 = scmp.ne.s32.totalorder %s641_s11, %s637_s10 }
   0xb   : > { %p50_p2 = scmp.eq.s32.totalorder %s653_s14, 0  ;;  %p55_p3 = scmp.ne.s32.totalorder %s637_s10, %s633_s9 }
   0xc   : > { %s819_s17 = smov (%p35_p0, %s33_s17), 0  ;;  %p56_p5 = scmp.eq.s32.totalorder %s416_s15, 0 }
   0xd   : > { %p713_p4 = por %p50_p2, %p49_p1  ;;  %s38_s20 = ssub.s32 %s649_s13, %s819_s17 }
   0xe   : > { %p105_p6 = scmp.eq.s32.totalorder %s416_s15, 1  ;;  %p40_p7 = scmp.eq.s32.totalorder %s38_s20, 0 }
   0xf   : > { %p719_p8 = por %p56_p5, %p55_p3  ;;  %p111_p10 = scmp.eq.s32.totalorder %s417_s16, 1 }
  0x10   : > { %p723_p9 = por %p105_p6, %p49_p1  ;;  %p419_p12 = scmp.ge.s32.totalorder %s653_s14, 2 }
  0x11   : > { %s728_s23 = scalar_select %p40_p7, %s641_s11, %s42_s18  }
  0x12   : > { %p730_p11 = por %p111_p10, %p55_p3  ;;  %p444_p13 = scmp.lt.s32.totalorder %s653_s14, 2 }
  0x13   : > { %s131_s25 = sand.u32 1, %s641_s11   ;;  %s421_s27 = sshll.u32 %s649_s13, 3 }
  0x14   : > { %s420_s26 = sshll.u32 %s131_s25, 3  ;;  %s141_s30 = scalar_lea.hbm %s806_s0, %s421_s27 }
  0x15   : > { %s135_s3 = scalar_lea.vmem [#allocation5], %s420_s26  ;;  %s143_s5 = sshll.u32 %s141_s30, 4  ;;  %s144_s5 = int_to_ptr.hbm [resolvable:$true] %s143_s5 }
  0x16   : > { %s145_s4 = sshll.u32 %s135_s3, 4  ;;  %p434_p0 = pnand %p444_p13, %p713_p4  ;;  %s146_s4 = int_to_ptr.vmem [resolvable:$true] %s145_s4 }
  0x17   : > { %p422_p1 = scmp.ge.s32.totalorder %s653_s14, 1  ;;  %p167_p2 = scmp.lt.s32.totalorder %s653_s14, 3 }
  0x18   : > { %s132_s6 = scalar_lea.sflag [#allocation6], %s131_s25  ;;  %s158_s15 = scalar_lea.hbm %s807_s1, %s649_s13 }
  0x19   : > { %436 = dma.hbm_to_vmem [thread:$0]  (!%p434_p0), %s144_s5, 128, %s146_s4, %s132_s6  }
  0x1a   : > { %p168_p3 = pnand %p422_p1, %p167_p2  ;;  %s155_s16 = scalar_lea.vmem [#allocation8], %s131_s25 }
  0x1b   : > { %s162_s18 = sshll.u32 %s155_s16, 4  ;;  %s160_s20 = sshll.u32 %s158_s15, 4  ;;  %s163_s18 = int_to_ptr.vmem [resolvable:$true] %s162_s18  ;;  %s161_s20 = int_to_ptr.hbm [resolvable:$true] %s160_s20 }
  0x1c   : > { %s153_s26 = scalar_lea.sflag [#allocation9], %s131_s25  ;;  %171 = sbr.rel (%p168_p3) target bundleno = 119 (0x77), region = 28 }
  0x1d   : > { %439 = dma.hbm_to_vmem [thread:$0]  (!%p434_p0), %s161_s20, 16, %s163_s18, %s153_s26  }
  0x1e   : > { %s750_s19 = sand.u32 (!%p168_p3), 1, %s637_s10  }
  0x1f   : > { %s423_s27 = sshll.u32 (!%p168_p3), %s750_s19, 3  ;;  %s174_s28 = scalar_lea.sflag (!%p168_p3), [#allocation6], %s750_s19 }
  0x20   : > { %s177_s29 = scalar_lea.vmem (!%p168_p3), [#allocation5], %s423_s27 }
  0x21   : > { %620 = dma.done.wait (%p719_p8), %s174_s28, 128  }
  0x22   : > { %622 = vsyncadd (%p719_p8), %s174_s28, 4294967168  ;;  %s184_s25 = scalar_lea.sflag [#allocation9], %s750_s19  ;;  %s186_s30 = scalar_lea.vmem [#allocation8], %s750_s19 }
  0x23   : > { %624 = dma.done.wait (%p719_p8), %s184_s25, 16  }
  0x24   : > { %626 = vsyncadd (%p719_p8), %s184_s25, 4294967280  ;;  %v655_v0 = vmov -1e+30   ;;  %v220_v1 = vlaneseq  ;;  %v656_v2 = vmov 0.0   ;;  %v218_v4 = vld [vmem:[%s177_s29] sm:$0xff]  ;;  %s424_s21 = sshll.u32 %s645_s12, 7  ;;  %s317_s5 = scalar_lea.hbm %s808_s2, %s645_s12 }
  0x25   : > { %215 = vst [vmem:[#allocation2] sm:$0x1] %v655_v0  ;;  %v496_v5 = vld [vmem:[%s186_s30] ss:$0 sm:$0xff]  ;;  %v227_v6 = vrot.slane %v218_v4, 4  ;;  %v303_v59 = vstv %s424_s21  ;;  %s210_s6 = scalar_lea.vmem [#allocation10], %s750_s19 }
  0x26   : > { %217 = vst [vmem:[#allocation4] sm:$0x1] %v656_v2  ;;  %v221_v3 = vshrl.u32 %v220_v1, 7  ;;  %v302_v57 = vand.u32 127, %v220_v1  ;;  %s319_s7 = sshll.u32 %s210_s6, 4  ;;  %s321_s8 = sshll.u32 %s317_s5, 4  ;;  %s320_s7 = int_to_ptr.vmem [resolvable:$true] %s319_s7  ;;  %s322_s8 = int_to_ptr.hbm [resolvable:$true] %s321_s8 }
  0x27   : > { %216 = vst [vmem:[#allocation3] sm:$0x1] %v656_v2  ;;  %v228_v7 = vmax.f32 %v218_v4, %v227_v6  ;;  %s309_s15 = scalar_lea.sflag [#allocation7], %s750_s19  ;;  %s581_s16 = sshra.s32 %s322_s8, 4  ;;  %s582_s16 = int_to_ptr.hbm [resolvable:$true] %s581_s16 }
  0x28   : > { %vm257_vm0 = vcmp.eq.s32.totalorder %v221_v3, %v496_v5  ;;  %v304_v62 = vadd.s32 %v303_v59, %v302_v57  ;;  %s583_s18 = scalar_lea.hbm %s582_s16, 1  ;;  %s587_s26 = scalar_lea.hbm %s808_s2, 2 }
  0x29   : > { %v258_v8 = vsel %vm257_vm0, %v218_v4, 0.0  ;;  %v229_v10 = vrot.slane %v228_v7, 2  ;;  %p584_p4 = scmp.ne.s32.totalorder %s582_s16, %s583_s18  ;;  %p588_p7 = scmp.lt.s32.totalorder %s582_s16, %s808_s2 }
  0x2a   : > { %v259_v9 = vrot.slane %v258_v8, 4  ;;  %vm305_vm5 = vcmp.lt.s32.totalorder %v304_v62, 200  ;;  %p589_p8 = scmp.lt.s32.totalorder %s587_s26, %s583_s18 }
  0x2b   : > { %v230_v12 = vmax.f32 %v228_v7, %v229_v10  ;;  %p585_p5 = pnand %p584_p4, %p723_p9 }
  0x2c   : > { %v260_v11 = vadd.f32 %v259_v9, %v258_v8  ;;  %v233_v15 = vld [vmem:[#allocation2] sm:$0x1]  ;;  %p590_p10 = por %p589_p8, %p588_p7 }
  0x2d   : > { %v231_v14 = vrot.slane %v230_v12, 1  ;;  %v255_v20 = vld [vmem:[#allocation4] sm:$0x1]  ;;  %p586_p6 = pneg %p585_p5 }
  0x2e   : > { %v261_v13 = vrot.slane %v260_v11, 2  ;;  %v241_v34 = vld [vmem:[#allocation3] sm:$0x1] }
  0x2f   : > { %v232_v17 = vmax.f32 %v230_v12, %v231_v14  ;;  %p591_p13 = pnand %p590_p10, %p586_p6 }
  0x30   : > { %v262_v16 = vadd.f32 %v261_v13, %v260_v11 }
  0x31   : > { %v234_v19 = vmax.f32 %v233_v15, %v232_v17 }
  0x32   : > { %v263_v18 = vrot.slane %v262_v16, 1 }
  0x33   : > { %v236_v22 = vperm.slane %v234_v19, 0  ;;  %254 = vst [vmem:[#allocation2] sm:$0x1] %v234_v19  ;;  %v242_v26 = vsub.f32 %v233_v15, %v234_v19 }
  0x34   : > { %v264_v21 = vadd.f32 %v263_v18, %v262_v16 }
  0x35   : > { %v238_v24 = vsub.f32 %v218_v4, %v236_v22  ;;  %v243_v27 = vmul.f32 1.442695, %v242_v26 }
  0x36   : > { %v265_v23 = vadd.f32 %v264_v21, %v255_v20 }
  0x37   : > { %v239_v25 = vmul.f32 1.442695, %v238_v24 }
  0x38   : > { %266 = vst [vmem:[#allocation4] sm:$0x1] %v265_v23 }
  0x39   : > { %497 = vpow2.f32 %v239_v25 }
  0x3a   : > { %499 = vpow2.f32 %v243_v27  ;;  %v270_v41 = vld [vmem:[#allocation2] sm:$0x1] }
  0x3f   : > { %v498_v28 = vpop.eup %497  ;;  %v272_v40 = vld [vmem:[#allocation4] sm:$0x1] }
  0x40   : > { %v246_v29 = vrot.slane %v498_v28, 4  ;;  %v500_v33 = vpop.eup %499  ;;  %v277_v42 = vsub.f32 %v272_v40, %v270_v41  ;;  %v273_v63 = vsub.f32 %v270_v41, %v272_v40 }
  0x41   : > { %v245_v36 = vmul.f32 %v500_v33, %v241_v34 }
  0x42   : > { %v247_v30 = vadd.f32 %v498_v28, %v246_v29  ;;  %v278_v44 = vmul.f32 1.442695, %v277_v42 }
  0x44   : > { %v248_v31 = vrot.slane %v247_v30, 2 }
  0x46   : > { %v249_v32 = vadd.f32 %v248_v31, %v247_v30 }
  0x48   : > { %v250_v35 = vrot.slane %v249_v32, 1 }
  0x4a   : > { %v251_v37 = vadd.f32 %v250_v35, %v249_v32 }
  0x4c   : > { %v252_v38 = vadd.f32 %v251_v37, %v245_v36 }
  0x4e   : > { %253 = vst [vmem:[#allocation3] sm:$0x1] %v252_v38 }
  0x55   : > { %v271_v39 = vld [vmem:[#allocation3] sm:$0x1] }
  0x56   : > { %501 = vrcp.f32 %v271_v39  ;;  %v291_v47 = vand.u32 2147483648, %v271_v39  ;;  %v289_v49 = vand.u32 2147483647, %v271_v39  ;;  %vm285_vm2 = vweird.f32 %v271_v39 }
  0x57   : > { %503 = vpow2.f32 %v278_v44 }
  0x58   : > { %505 = vlog2.f32 %v271_v39  ;;  %v292_v51 = vor.u32 1.1754944e-38, %v291_v47  ;;  %vm290_vm4 = vcmp.eq.f32.partialorder %v289_v49, 8.507059e+37 }
  0x5c   : > { %v502_v43 = vpop.eup %501 }
  0x5d   : > { %v281_v45 = vmul.f32 %v502_v43, %v271_v39  ;;  %vm286_vm1 = vweird.f32 %v502_v43  ;;  %v504_v53 = vpop.eup %503 }
  0x5e   : > { %vm287_vm3 = vmor %vm285_vm2, %vm286_vm1  ;;  %v506_v56 = vpop.eup %505 }
  0x5f   : > { %v282_v46 = vsub.f32 1.0, %v281_v45  ;;  %v275_v60 = vmul.f32 0.6931472, %v506_v56 }
  0x61   : > { %v283_v48 = vmul.f32 %v502_v43, %v282_v46  ;;  %v276_v2 = vadd.f32 %v275_v60, %v273_v63 }
  0x63   : > { %v284_v50 = vadd.f32 %v502_v43, %v283_v48 }
  0x65   : > { %v288_v52 = vsel %vm287_vm3, %v502_v43, %v284_v50 }
  0x66   : > { %v293_v54 = vsel %vm290_vm4, %v292_v51, %v288_v52 }
  0x67   : > { %v294_v55 = vmul.f32 %v504_v53, %v293_v54 }
  0x69   : > { %v295_v58 = vsub.f32 1.0, %v294_v55 }
  0x6b   : > { %v296_v61 = vmax.f32 %v295_v58, 0.0 }
  0x6d   : > { %v297_v0 = vmul.f32 %v296_v61, %v296_v61 }
  0x6f   : > { %v298_v3 = vmul.f32 0.25, %v297_v0 }
  0x71   : > { %v299_v1 = vmul.f32 %v298_v3, %v276_v2 }
  0x73   : > { %v306_v4 = vsel %vm305_vm5, %v299_v1, 0.0 }
  0x74   : > { %307 = vst [vmem:[%s210_s6] sm:$0x1] %v306_v4 }
  0x75   : > { %594 = shalt.err (!%p591_p13)
}
  0x76   : > { %431 = dma.vmem_to_hbm [thread:$0]  (%p723_p9), %s320_s7, 16, %s322_s8, %s309_s15  }
  0x77 PF: > { %s333_s19 = sand.u32 1, %s633_s9   ;;  %p441_p0 = pnand %p419_p12, %p730_p11 }
  0x78   : > { %s334_s29 = scalar_lea.sflag [#allocation7], %s333_s19 }
  0x79   : > { %p442_p1 = pneg %p441_p0 }
  0x7b   : > { %628 = dma.done.wait (%p442_p1), %s334_s29, 16  }
  0x7c   : > { %630 = vsyncadd (%p442_p1), %s334_s29, 4294967280  ;;  %s21_s14 = sadd.s32 1, %s653_s14   ;;  %s813_s9 = smov %s637_s10 }
  0x7d   : > { %p18_p2 = scmp.ge.s32.totalorder %s21_s14, 4   ;;  %s814_s10 = smov %s641_s11 }
  0x7e   : > { %s815_s11 = smov %s728_s23  ;;  %s816_s12 = smov %s649_s13 }
  0x7f   : > { %s817_s13 = smov %s819_s17  ;;  %20 = sbr.rel (!%p18_p2) target bundleno = 8 (0x8), region = 94 }
  0x84   :  { %339 = vsyncpa [#allocation6], 1 }
  0x85   :  { %341 = vsyncpa [#allocation6 + $0x1], 1 }
  0x86   :  { %342 = vsyncpa [#allocation9], 1 }
  0x87   :  { %344 = vsyncpa [#allocation9 + $0x1], 1 }
  0x88   :  { %345 = vsyncpa [#allocation7], 1 }
  0x89   :  { %347 = vsyncpa [#allocation7 + $0x1], 1 }

</bundles_post_ra>
